<compile_context>
chip_gen: v5e
topology: v5e:2x2
jax: 0.10.0
libtpu: 0.0.40
codegen_flags: <defaults>
</compile_context>

<pallas_src>
import functools
import math

import jax
import jax.numpy as jnp
from jax.experimental import pallas as pl
from jax.experimental.pallas import tpu as pltpu


_GELU_C = math.sqrt(2.0 / math.pi)


def _new_gelu_f32(x):
    # tanh approximation of GELU, identical to nanoGPT's new_gelu, in f32
    # (VPU for mul/add, EUP for tanh).
    return 0.5 * x * (1.0 + jnp.tanh(_GELU_C * (x + 0.044715 * (x * x * x))))


# ----------------------------------------------------------------------------
# Tiled matmul + bias (+ optional GELU) kernel:  out = act(x @ w + b)
# ----------------------------------------------------------------------------
def _matmul_bias_act_kernel(x_ref, w_ref, b_ref, o_ref, acc_ref, *, activation):
    k = pl.program_id(2)

    @pl.when(k == 0)
    def _init():
        acc_ref[...] = jnp.zeros_like(acc_ref)

    # bf16 x bf16 -> f32 accumulate on the MXU.
    acc_ref[...] += jnp.dot(
        x_ref[...], w_ref[...], preferred_element_type=jnp.float32
    )

    @pl.when(k == pl.num_programs(2) - 1)
    def _epilogue():
        out = acc_ref[...] + b_ref[...].astype(jnp.float32)
        if activation == "gelu":
            out = _new_gelu_f32(out)
        o_ref[...] = out.astype(o_ref.dtype)


def _choose_tile(dim, preferred, align):
    """Largest multiple of `align` <= preferred that divides `dim`; falls back
    to the full dimension (which always satisfies the (8,128) block rule)."""
    if dim <= preferred:
        return dim
    t = (preferred // align) * align
    while t >= align:
        if dim % t == 0:
            return t
        t -= align
    return dim


def matmul_bias_act(
    x2d, w_t, b, *, activation=None, out_dtype=jnp.float32,
    tm=256, tn=256, tk=512,
):
    """x2d: (M, K) bf16, w_t: (K, N) bf16 (pre-transposed), b: (N,) f32."""
    M, K = x2d.shape
    K2, N = w_t.shape
    assert K == K2, (K, K2)

    tm = _choose_tile(M, tm, 8)
    tn = _choose_tile(N, tn, 128)
    tk = _choose_tile(K, tk, 128)
    grid = (M // tm, N // tn, K // tk)

    kernel = functools.partial(_matmul_bias_act_kernel, activation=activation)
    return pl.pallas_call(
        kernel,
        out_shape=jax.ShapeDtypeStruct((M, N), out_dtype),
        grid_spec=pltpu.PrefetchScalarGridSpec(
            num_scalar_prefetch=0,
            grid=grid,
            in_specs=[
                pl.BlockSpec((tm, tk), lambda i, j, k: (i, k)),
                pl.BlockSpec((tk, tn), lambda i, j, k: (k, j)),
                pl.BlockSpec((1, tn), lambda i, j, k: (0, j)),
            ],
            out_specs=pl.BlockSpec((tm, tn), lambda i, j, k: (i, j)),
            scratch_shapes=[pltpu.VMEM((tm, tn), jnp.float32)],
        ),
        compiler_params=pltpu.CompilerParams(
            dimension_semantics=("parallel", "parallel", "arbitrary"),
        ),
    )(x2d, w_t, b.reshape(1, N))


# ----------------------------------------------------------------------------
# Full MLP forward
# ----------------------------------------------------------------------------
def mlp_forward(x, params):
    B, T, C = x.shape
    x2d = x.reshape(B * T, C).astype(jnp.bfloat16)

    # c_fc + new_gelu fused (intermediate kept bf16 -> half the HBM traffic).
    h = matmul_bias_act(
        x2d, params["w_fc_t"], params["b_fc"],
        activation="gelu", out_dtype=jnp.bfloat16,
    )
    # c_proj (final output emitted f32 to match the PyTorch module's dtype).
    y = matmul_bias_act(
        h, params["w_proj_t"], params["b_proj"],
        activation=None, out_dtype=jnp.float32,
    )
    # TODO(synk): nn.Dropout treated as identity (eval mode / p=0.0); no RNG dropout.
    return y.reshape(B, T, C)


def init_params(key, n_embd):
    k1, k2, k3, k4 = jax.random.split(key, 4)
    hidden = 4 * n_embd
    # nn.Linear(n_embd, 4*n_embd) weight is (4C, C); store pre-transposed bf16.
    w_fc = 0.02 * jax.random.normal(k1, (hidden, n_embd), jnp.float32)
    b_fc = 0.02 * jax.random.normal(k2, (hidden,), jnp.float32)
    w_proj = 0.02 * jax.random.normal(k3, (n_embd, hidden), jnp.float32)
    b_proj = 0.02 * jax.random.normal(k4, (n_embd,), jnp.float32)
    return {
        "w_fc_t": w_fc.T.astype(jnp.bfloat16),      # (C, 4C)
        "b_fc": b_fc,                               # f32
        "w_proj_t": w_proj.T.astype(jnp.bfloat16),  # (4C, C)
        "b_proj": b_proj,                           # f32
    }


if __name__ == "__main__":
    # small config consistent with the module: batch=2, seq=8, n_embd=32 -> hidden=128
    B, T, C = 2, 8, 32
    key = jax.random.PRNGKey(0)
    kx, kp = jax.random.split(key)
    x = jax.random.normal(kx, (B, T, C), jnp.float32)
    params = init_params(kp, C)

    y = mlp_forward(x, params)
    jax.block_until_ready(y)
    assert y.shape == (B, T, C)

    # pure-JAX reference on the same bf16-quantized operands, f32 math.
    xb = x.astype(jnp.bfloat16).astype(jnp.float32).reshape(B * T, C)
    wf = params["w_fc_t"].astype(jnp.float32)
    wp = params["w_proj_t"].astype(jnp.float32)
    h_ref = _new_gelu_f32(xb @ wf + params["b_fc"])
    ref = (h_ref @ wp + params["b_proj"]).reshape(B, T, C)
    err = float(jnp.max(jnp.abs(y - ref)))
    assert err < 2e-2, f"max abs err {err}"

    print("KERNEL_OK")
</pallas_src>

<mosaic_0001>
module attributes {stable_mosaic.version = 11 : i64} {
  func.func @_matmul_bias_act_kernel(%arg0: i32, %arg1: i32, %arg2: i32, %arg3: memref<16x32xbf16, #tpu.memory_space<vmem>>, %arg4: memref<32x128xbf16, #tpu.memory_space<vmem>>, %arg5: memref<1x128xf32, #tpu.memory_space<vmem>>, %arg6: memref<16x128xbf16, #tpu.memory_space<vmem>>, %arg7: memref<16x128xf32, #tpu.memory_space<vmem>>) attributes {dimension_semantics = [#tpu.dimension_semantics<parallel>, #tpu.dimension_semantics<parallel>, #tpu.dimension_semantics<arbitrary>], iteration_bounds = array<i64: 1, 1, 1>, scalar_prefetch = 0 : i64, scratch_operands = 1 : i64, tpu.core_type = #tpu.core_type<tc>, window_params = [{transform_indices = @transform_0, window_bounds = array<i64: 16, 32>}, {transform_indices = @transform_1, window_bounds = array<i64: 32, 128>}, {transform_indices = @transform_2, window_bounds = array<i64: 1, 128>}, {transform_indices = @transform_3, window_bounds = array<i64: 16, 128>}]} {
    %c0_i32 = arith.constant 0 : i32
    %0 = arith.cmpi eq, %arg2, %c0_i32 : i32
    %1 = arith.extui %0 : i1 to i32
    %c0_i32_0 = arith.constant 0 : i32
    %2 = arith.cmpi ne, %1, %c0_i32_0 : i32
    scf.if %2 {
      %cst_10 = arith.constant 0.000000e+00 : f32
      %12 = vector.broadcast %cst_10 : f32 to vector<16x128xf32>
      %c0_11 = arith.constant 0 : index
      %c0_12 = arith.constant 0 : index
      %13 = vector.load %arg7[%c0_11, %c0_12] : memref<16x128xf32, #tpu.memory_space<vmem>>, vector<16x128xf32>
      tpu.vector_store %arg7[%c0_11, %c0_12], %12 {strides = array<i32>} : memref<16x128xf32, #tpu.memory_space<vmem>>, vector<16x128xf32>,
    } else {
    }
    %c0 = arith.constant 0 : index
    %c0_1 = arith.constant 0 : index
    %3 = vector.load %arg7[%c0, %c0_1] : memref<16x128xf32, #tpu.memory_space<vmem>>, vector<16x128xf32>
    %c0_2 = arith.constant 0 : index
    %c0_3 = arith.constant 0 : index
    %4 = vector.load %arg3[%c0_2, %c0_3] : memref<16x32xbf16, #tpu.memory_space<vmem>>, vector<16x32xbf16>
    %c0_4 = arith.constant 0 : index
    %c0_5 = arith.constant 0 : index
    %5 = vector.load %arg4[%c0_4, %c0_5] : memref<32x128xbf16, #tpu.memory_space<vmem>>, vector<32x128xbf16>
    %cst = arith.constant dense<0.000000e+00> : vector<16x128xf32>
    %6 = tpu.matmul %4, %5, %cst {dimension_numbers = #tpu.dot_dimension_numbers<[1], [0], [0], [1], [0, 0, 1, 1], [], []>} : vector<16x32xbf16>, vector<32x128xbf16>, vector<16x128xf32> -> vector<16x128xf32>
    %7 = arith.addf %3, %6 : vector<16x128xf32>
    %c0_6 = arith.constant 0 : index
    %c0_7 = arith.constant 0 : index
    %8 = vector.load %arg7[%c0_6, %c0_7] : memref<16x128xf32, #tpu.memory_space<vmem>>, vector<16x128xf32>
    tpu.vector_store %arg7[%c0_6, %c0_7], %7 {strides = array<i32>} : memref<16x128xf32, #tpu.memory_space<vmem>>, vector<16x128xf32>,
    %c0_i32_8 = arith.constant 0 : i32
    %9 = arith.cmpi eq, %arg2, %c0_i32_8 : i32
    %10 = arith.extui %9 : i1 to i32
    %c0_i32_9 = arith.constant 0 : i32
    %11 = arith.cmpi ne, %10, %c0_i32_9 : i32
    scf.if %11 {
      %c0_10 = arith.constant 0 : index
      %c0_11 = arith.constant 0 : index
      %12 = vector.load %arg7[%c0_10, %c0_11] : memref<16x128xf32, #tpu.memory_space<vmem>>, vector<16x128xf32>
      %c0_12 = arith.constant 0 : index
      %c0_13 = arith.constant 0 : index
      %13 = vector.load %arg5[%c0_12, %c0_13] : memref<1x128xf32, #tpu.memory_space<vmem>>, vector<1x128xf32>
      %14 = vector.broadcast %13 : vector<1x128xf32> to vector<16x128xf32>
      %15 = arith.addf %12, %14 : vector<16x128xf32>
      %cst_14 = arith.constant 5.000000e-01 : f32
      %16 = vector.broadcast %cst_14 : f32 to vector<16x128xf32>
      %17 = arith.mulf %16, %15 : vector<16x128xf32>
      %18 = arith.mulf %15, %15 : vector<16x128xf32>
      %19 = arith.mulf %18, %15 : vector<16x128xf32>
      %cst_15 = arith.constant 4.471500e-02 : f32
      %20 = vector.broadcast %cst_15 : f32 to vector<16x128xf32>
      %21 = arith.mulf %20, %19 : vector<16x128xf32>
      %22 = arith.addf %15, %21 : vector<16x128xf32>
      %cst_16 = arith.constant 0.797884583 : f32
      %23 = vector.broadcast %cst_16 : f32 to vector<16x128xf32>
      %24 = arith.mulf %23, %22 : vector<16x128xf32>
      %25 = math.tanh %24 : vector<16x128xf32>
      %cst_17 = arith.constant 1.000000e+00 : f32
      %26 = vector.broadcast %cst_17 : f32 to vector<16x128xf32>
      %27 = arith.addf %26, %25 : vector<16x128xf32>
      %28 = arith.mulf %17, %27 : vector<16x128xf32>
      %29 = arith.truncf %28 : vector<16x128xf32> to vector<16x128xbf16>
      %c0_18 = arith.constant 0 : index
      %c0_19 = arith.constant 0 : index
      %30 = vector.load %arg6[%c0_18, %c0_19] : memref<16x128xbf16, #tpu.memory_space<vmem>>, vector<16x128xbf16>
      tpu.vector_store %arg6[%c0_18, %c0_19], %29 {strides = array<i32>} : memref<16x128xbf16, #tpu.memory_space<vmem>>, vector<16x128xbf16>,
    } else {
    }
    return
  }
  func.func @transform_0(%arg0: i32, %arg1: i32, %arg2: i32) -> (i32, i32) {
    %c0_i32 = arith.constant 0 : i32
    return %arg0, %arg2 : i32, i32
  }
  func.func @transform_1(%arg0: i32, %arg1: i32, %arg2: i32) -> (i32, i32) {
    %c0_i32 = arith.constant 0 : i32
    return %arg2, %arg1 : i32, i32
  }
  func.func @transform_2(%arg0: i32, %arg1: i32, %arg2: i32) -> (i32, i32) {
    %c0_i32 = arith.constant 0 : i32
    %c0_i32_0 = arith.constant 0 : i32
    return %c0_i32, %arg1 : i32, i32
  }
  func.func @transform_3(%arg0: i32, %arg1: i32, %arg2: i32) -> (i32, i32) {
    %c0_i32 = arith.constant 0 : i32
    return %arg0, %arg1 : i32, i32
  }
}

</mosaic_0001>

<bundles_post_ra>
// kernel: tpu_custom_call.1
= control target key start
LH: loop header
LB: loop body
LE: loop exit
PB: predicated region body
PF: predicated region fallthrough
CT: control target
= control target key end

     0   :  { %8 = vsyncpa [#allocation4], 0  ;;  %s309_s0 = inlined_call_operand.hbm [shape: bf16[16,32], index: 0, kind: input, shape index: {}]   ;;  %s310_s1 = inlined_call_operand.hbm [shape: bf16[32,128], index: 1, kind: input, shape index: {}]   ;;  %s311_s2 = inlined_call_operand.vmem [shape: f32[1,128], index: 2, kind: input, shape index: {}]   ;;  %s312_s3 = inlined_call_operand.hbm [shape: bf16[16,128], index: 3, kind: output, shape index: {}]  }
   0x1   :  { %9 = vsyncpa [#allocation7], 0 }
   0x2   :  { %10 = vsyncpa [#allocation5], 0  ;;  %s15_s14 = sshll.u32 %s309_s0, 4  ;;  %s263_s15 = smov [#allocation3]   ;;  %s16_s14 = int_to_ptr.hbm [resolvable:$true] %s15_s14 }
   0x3   :  { %s17_s16 = sshll.u32 %s263_s15, 4  ;;  %s28_s19 = sshll.u32 %s310_s1, 4  ;;  %s18_s16 = int_to_ptr.vmem [resolvable:$true] %s17_s16  ;;  %s29_s19 = int_to_ptr.hbm [resolvable:$true] %s28_s19 }
   0x4   :  { %s264_s20 = smov 64   ;;  %s265_s21 = smov 4  }
   0x5   :  { %23 = dma.hbm_to_vmem [thread:$0]  %s16_s14, 128, %s18_s16, [#allocation4], %s264_s20, %s264_s20, %s265_s21  }
   0x6   :  { %s266_s22 = smov [#allocation6]  }
   0x7   :  { %s30_s23 = sshll.u32 %s266_s22, 4  ;;  %s31_s23 = int_to_ptr.vmem [resolvable:$true] %s30_s23 }
   0x8   :  { %36 = dma.hbm_to_vmem [thread:$0]  %s29_s19, 256, %s31_s23, [#allocation7], %s264_s20, %s264_s20, %s265_s21  }
   0x9   :  { %257 = dma.done.wait [#allocation4], 128  }
   0xa   :  { %258 = vsyncadd [#allocation4], 4294967168 }
   0xb   :  { %259 = dma.done.wait [#allocation7], 256  }
   0xc   :  { %260 = vsyncadd [#allocation7], 4294967040  ;;  %v169_v0 = vld [vmem:[#allocation6 + $0x8] sm:$0xff]  ;;  %v168_v1 = vld [vmem:[#allocation6] sm:$0xff]  ;;  %vm79_vm0 = vcmask 261120   ;;  %s140_s27 = sshll.u32 %s312_s3, 4  ;;  %s141_s27 = int_to_ptr.hbm [resolvable:$true] %s140_s27 }
   0xd   :  { %89 = vmatpush.bf16.msra.mxu0 %v169_v0  ;;  %v167_v2 = vld [vmem:[#allocation3] sm:$0xff] }
   0xe   :  { %v180_v3 = vld [vmem:[%s311_s2] ss:$0 sm:$0xff]  ;;  %s267_s2 = smov [#allocation8]  }
   0xf   :  { %s138_s24 = sshll.u32 %s267_s2, 4  ;;  %s139_s24 = int_to_ptr.vmem [resolvable:$true] %s138_s24 }
  0x11   :  { %90 = vmatpush.bf16.msra.mxu0 %v168_v1 }
  0x14   :  { %166 = vmatmul.msk.bf16.vlgmr.msra.gmra.mxu0 %vm79_vm0, %v167_v2 }
  0x91   :  { %v92_v4 = vpop.f32.mrf.mxu0 }
  0x92   :  { %v110_v5 = vadd.f32 %v180_v3, %v92_v4 }
  0x94   :  { %v114_v6 = vmul.f32 %v110_v5, %v110_v5  ;;  %v112_v21 = vmul.f32 0.5, %v110_v5 }
  0x96   :  { %v116_v7 = vmul.f32 %v114_v6, %v110_v5 }
  0x98   :  { %v118_v8 = vmul.f32 0.044715, %v116_v7 }
  0x99   :  { %v94_v9 = vpop.f32.mrf.mxu0 }
  0x9a   :  { %v120_v10 = vadd.f32 %v118_v8, %v110_v5  ;;  %v111_v11 = vadd.f32 %v180_v3, %v94_v9 }
  0x9c   :  { %v115_v12 = vmul.f32 %v111_v11, %v111_v11  ;;  %v122_v13 = vmul.f32 0.7978846, %v120_v10  ;;  %v113_v22 = vmul.f32 0.5, %v111_v11 }
  0x9e   :  { %v117_v14 = vmul.f32 %v115_v12, %v111_v11  ;;  %181 = vtanh.f32 %v122_v13 }
  0xa0   :  { %v119_v15 = vmul.f32 0.044715, %v117_v14 }
  0xa2   :  { %v121_v16 = vadd.f32 %v119_v15, %v111_v11 }
  0xa4   :  { %v123_v17 = vmul.f32 0.7978846, %v121_v16  ;;  %v182_v18 = vpop.eup %181 }
  0xa5   :  { %v126_v19 = vadd.f32 1.0, %v182_v18 }
  0xa6   :  { %183 = vtanh.f32 %v123_v17 }
  0xa7   :  { %v128_v24 = vmul.f32 %v126_v19, %v112_v21 }
  0xac   :  { %v184_v20 = vpop.eup %183 }
  0xad   :  { %v127_v23 = vadd.f32 1.0, %v184_v20 }
  0xaf   :  { %v129_v25 = vmul.f32 %v127_v23, %v113_v22 }
  0xb1   :  { %v173_v26 = vpack.c.bf16 %v129_v25, %v128_v24 }
  0xb3   :  { %174 = vst [vmem:[#allocation8] sm:$0xff] %v173_v26  }
  0xb4   :  { %146 = dma.vmem_to_hbm [thread:$0]  %s139_s24, 128, %s141_s27, [#allocation5], %s264_s20, %s264_s20, %s265_s21  }
  0xb5   :  { %261 = dma.done.wait [#allocation5], 128  }
  0xb6   :  { %262 = vsyncadd [#allocation5], 4294967168 }
  0xb7   :  { %151 = vsyncpa [#allocation4], 1 }
  0xb8   :  { %152 = vsyncpa [#allocation7], 1 }
  0xb9   :  { %153 = vsyncpa [#allocation5], 1 }

</bundles_post_ra>
